<compile_context>
chip_gen: v5e
topology: v5e:2x2
jax: 0.10.0
libtpu: 0.0.40
codegen_flags: <defaults>
</compile_context>

<pallas_src>
import jax
import jax.numpy as jnp
from jax.experimental import pallas as pl
from jax.experimental.pallas import tpu as pltpu

_LANE = 128


def _softmax_dim0_kernel(x_ref, o_ref):
    # Whole (N, td) column strip resident in VMEM: dim-0 reduction on-chip.
    exp_x = jnp.exp(x_ref[...].astype(jnp.float32))        # EUP
    denom = jnp.sum(exp_x, axis=0, keepdims=True)           # XLU reduce -> (1, td)
    # One reciprocal per lane-column, then a cheap VPU broadcast-multiply
    # instead of an (N, td) divide. approx=False: ~1 ulp, stays within 1e-5.
    inv = pl.reciprocal(denom, approx=False)
    o_ref[...] = (exp_x * inv).astype(o_ref.dtype)


def _round_up(v, m):
    return (v + m - 1) // m * m


def _pick_tile_d(n, d_pad, in_bytes, out_bytes):
    """Largest lane tile (multiple of 128, dividing d_pad) fitting the VMEM budget."""
    # Per lane-column footprint: double-buffered input + output + f32 exp temp.
    per_col = n * (2 * in_bytes + 2 * out_bytes + 4)
    budget = 24 * 1024 * 1024  # conservative: ~half of v7x's 64 MiB physical VMEM
    cap = max(_LANE, min((budget // per_col) // _LANE * _LANE, 2048, d_pad))
    # v7x has 2 TensorCores: keep >= 2 steps on the parallel axis when D allows,
    # so column strips shard across both cores.
    if cap >= d_pad and d_pad >= 2 * _LANE:
        cap = max(_LANE, (d_pad // 2) // _LANE * _LANE)
    # Largest multiple of 128 <= cap that divides d_pad evenly: no ragged tail,
    # every output store is an unmasked, lane-dense vst.
    td = cap
    while d_pad % td != 0:
        td -= _LANE
    return td


def my_softmax(x):
    """exp(x) / exp(x).sum(axis=0) for a 2D array x of shape (N, D)."""
    assert x.ndim == 2, "this wrapper handles 2D inputs (N, D)"
    n, d = x.shape
    in_bytes = x.dtype.itemsize
    out_bytes = in_bytes

    if d <= _LANE:
        # Tiny feature dim: a single full-array block (block dims == array
        # dims satisfies the layout rules), no padding / tail handling.
        d_pad, td = d, d
        xp = x
    else:
        # Pad D to a multiple of 128 so all stores stay lane-dense. Softmax
        # over dim=0 is column-independent, so zero-padded columns cannot
        # perturb real columns; they are sliced off afterwards.
        d_pad = _round_up(d, _LANE)
        xp = jnp.pad(x, ((0, 0), (0, d_pad - d))) if d_pad != d else x
        td = _pick_tile_d(n, d_pad, in_bytes, out_bytes)

    grid = (pl.cdiv(d_pad, td),)

    # Explicit VMEM budget: double-buffered in+out tiles + f32 intermediate,
    # plus headroom; clamped below v7x's 64 MiB physical VMEM.
    tile_bytes = n * td * (2 * in_bytes + 2 * out_bytes + 4)
    vmem_limit = int(min(48 * 1024 * 1024,
                         max(32 * 1024 * 1024, tile_bytes + (8 << 20))))

    # TODO(synk): for very large N (>= ~8K rows f32) the whole-column-strip
    # design should switch to a two-pass (partial-sum then normalize) scheme
    # that also tiles N; not needed at these shapes.
    out = pl.pallas_call(
        _softmax_dim0_kernel,
        out_shape=jax.ShapeDtypeStruct((n, d_pad), x.dtype),
        grid_spec=pltpu.PrefetchScalarGridSpec(
            num_scalar_prefetch=0,
            grid=grid,
            in_specs=[pl.BlockSpec((n, td), lambda j: (0, j))],
            out_specs=pl.BlockSpec((n, td), lambda j: (0, j)),
        ),
        compiler_params=pltpu.CompilerParams(
            dimension_semantics=("parallel",),
            vmem_limit_bytes=vmem_limit,
        ),
    )(xp)

    return out[:, :d] if d_pad != d else out


if __name__ == "__main__":
    key = jax.random.PRNGKey(0)
    # Small shapes consistent with the module's forward (softmax over dim=0):
    # the canonical test shape plus a multi-tile and a non-128-multiple case.
    shapes = [(8, 128), (8, 384), (16, 200)]
    for i, shape in enumerate(shapes):
        k = jax.random.fold_in(key, i)
        x = jax.random.normal(k, shape, dtype=jnp.float32)
        out = jax.block_until_ready(my_softmax(x))
        ref = jnp.exp(x) / jnp.exp(x).sum(axis=0)
        assert out.shape == x.shape and out.dtype == x.dtype
        assert jnp.allclose(out, ref, atol=1e-5, rtol=1e-5)
    print("KERNEL_OK")
</pallas_src>

<mosaic_0001>
module attributes {stable_mosaic.version = 11 : i64} {
  func.func @_softmax_dim0_kernel(%arg0: i32, %arg1: memref<8x128xf32, #tpu.memory_space<vmem>>, %arg2: memref<8x128xf32, #tpu.memory_space<vmem>>) attributes {dimension_semantics = [#tpu.dimension_semantics<parallel>], iteration_bounds = array<i64: 1>, scalar_prefetch = 0 : i64, scratch_operands = 0 : i64, tpu.core_type = #tpu.core_type<tc>, window_params = [{transform_indices = @transform_0, window_bounds = array<i64: 8, 128>}, {transform_indices = @transform_1, window_bounds = array<i64: 8, 128>}]} {
    %c0 = arith.constant 0 : index
    %c0_0 = arith.constant 0 : index
    %0 = vector.load %arg1[%c0, %c0_0] : memref<8x128xf32, #tpu.memory_space<vmem>>, vector<8x128xf32>
    %1 = math.exp %0 : vector<8x128xf32>
    %cst = arith.constant dense<0.000000e+00> : vector<128xf32>
    %2 = vector.multi_reduction <add>, %1, %cst [0] : vector<8x128xf32> to vector<128xf32>
    %3 = vector.shape_cast %2 : vector<128xf32> to vector<1x128xf32>
    %4 = tpu.reciprocal %3 : vector<1x128xf32> -> vector<1x128xf32>
    %5 = vector.broadcast %4 : vector<1x128xf32> to vector<8x128xf32>
    %6 = arith.mulf %1, %5 : vector<8x128xf32>
    %c0_1 = arith.constant 0 : index
    %c0_2 = arith.constant 0 : index
    %7 = vector.load %arg2[%c0_1, %c0_2] : memref<8x128xf32, #tpu.memory_space<vmem>>, vector<8x128xf32>
    tpu.vector_store %arg2[%c0_1, %c0_2], %6 {strides = array<i32>} : memref<8x128xf32, #tpu.memory_space<vmem>>, vector<8x128xf32>,
    return
  }
  func.func @transform_0(%arg0: i32) -> (i32, i32) {
    %c0_i32 = arith.constant 0 : i32
    %c0_i32_0 = arith.constant 0 : i32
    return %c0_i32, %arg0 : i32, i32
  }
  func.func @transform_1(%arg0: i32) -> (i32, i32) {
    %c0_i32 = arith.constant 0 : i32
    %c0_i32_0 = arith.constant 0 : i32
    return %c0_i32, %arg0 : i32, i32
  }
}

</mosaic_0001>

<bundles_post_ra>
// kernel: tpu_custom_call.1
= control target key start
LH: loop header
LB: loop body
LE: loop exit
PB: predicated region body
PF: predicated region fallthrough
CT: control target
= control target key end

     0   :  { %6 = vsyncpa [#allocation3], 0  ;;  %s141_s0 = inlined_call_operand.hbm [shape: f32[8,128], index: 0, kind: input, shape index: {}]   ;;  %s142_s1 = inlined_call_operand.hbm [shape: f32[8,128], index: 1, kind: output, shape index: {}]  }
   0x1   :  { %7 = vsyncpa [#allocation4], 0  ;;  %s13_s8 = sshll.u32 %s141_s0, 4  ;;  %s123_s9 = smov [#allocation2]   ;;  %s14_s8 = int_to_ptr.hbm [resolvable:$true] %s13_s8 }
   0x2   :  { %s15_s10 = sshll.u32 %s123_s9, 4  ;;  %s16_s10 = int_to_ptr.vmem [resolvable:$true] %s15_s10 }
   0x3   :  { %18 = dma.hbm_to_vmem [thread:$0]  %s14_s8, 128, %s16_s10, [#allocation3]  }
   0x4   :  { %119 = dma.done.wait [#allocation3], 128  }
   0x5   :  { %120 = vsyncadd [#allocation3], 4294967168  ;;  %v23_v0 = vld [vmem:[#allocation2] sm:$0xff]  ;;  %s124_s0 = smov [#allocation5]   ;;  %s55_s14 = sshll.u32 %s142_s1, 4  ;;  %s56_s14 = int_to_ptr.hbm [resolvable:$true] %s55_s14 }
   0x6   :  { %v24_v1 = vmul.f32 1.442695, %v23_v0  ;;  %s53_s11 = sshll.u32 %s124_s0, 4  ;;  %s54_s11 = int_to_ptr.vmem [resolvable:$true] %s53_s11 }
   0x8   :  { %67 = vpow2.f32 %v24_v1 }
   0xe   :  { %v68_v2 = vpop.eup %67 }
   0xf   :  { %v26_v3 = vrot.slane %v68_v2, 4 }
  0x11   :  { %v27_v4 = vadd.f32 %v68_v2, %v26_v3 }
  0x13   :  { %v28_v5 = vrot.slane %v27_v4, 2 }
  0x15   :  { %v29_v6 = vadd.f32 %v28_v5, %v27_v4 }
  0x17   :  { %v30_v7 = vrot.slane %v29_v6, 1 }
  0x19   :  { %v31_v8 = vadd.f32 %v30_v7, %v29_v6 }
  0x1b   :  { %69 = vrcp.f32 %v31_v8  ;;  %v43_v11 = vand.u32 2147483648, %v31_v8  ;;  %vm37_vm0 = vweird.f32 %v31_v8  ;;  %v41_v13 = vand.u32 2147483647, %v31_v8 }
  0x1d   :  { %v44_v15 = vor.u32 1.1754944e-38, %v43_v11  ;;  %vm42_vm3 = vcmp.eq.f32.partialorder %v41_v13, 8.507059e+37 }
  0x21   :  { %v70_v9 = vpop.eup %69 }
  0x22   :  { %v33_v10 = vmul.f32 %v70_v9, %v31_v8  ;;  %vm38_vm1 = vweird.f32 %v70_v9 }
  0x23   :  { %vm39_vm2 = vmor %vm37_vm0, %vm38_vm1 }
  0x24   :  { %v34_v12 = vsub.f32 1.0, %v33_v10 }
  0x26   :  { %v35_v14 = vmul.f32 %v70_v9, %v34_v12 }
  0x28   :  { %v36_v16 = vadd.f32 %v70_v9, %v35_v14 }
  0x2a   :  { %v40_v17 = vsel %vm39_vm2, %v70_v9, %v36_v16 }
  0x2b   :  { %v45_v18 = vsel %vm42_vm3, %v44_v15, %v40_v17 }
  0x2c   :  { %v46_v19 = vmul.f32 %v68_v2, %v45_v18 }
  0x2e   :  { %47 = vst [vmem:[#allocation5] sm:$0xff] %v46_v19 }
  0x2f   :  { %58 = dma.vmem_to_hbm [thread:$0]  %s54_s11, 128, %s56_s14, [#allocation4]  }
  0x30   :  { %121 = dma.done.wait [#allocation4], 128  }
  0x31   :  { %122 = vsyncadd [#allocation4], 4294967168 }
  0x32   :  { %63 = vsyncpa [#allocation3], 1 }
  0x33   :  { %64 = vsyncpa [#allocation4], 1 }

</bundles_post_ra>
